<compile_context>
chip_gen: v7x
topology: tpu7x:2x2x1
jax: 0.10.0
libtpu: 0.0.40
codegen_flags: <defaults>
</compile_context>

<pallas_src>
import jax
import jax.numpy as jnp
from jax.experimental import pallas as pl
from jax.experimental.pallas import tpu as pltpu

LEAKY_SLOPE = 0.01   # nn.LeakyReLU default
LN_EPS = 1e-5        # nn.LayerNorm default
LANE = 128
SUBLANE = 8


def _round_up(x, m):
    return (x + m - 1) // m * m


def _sublane(dtype):
    # 8 rows per vreg at 32-bit; sub-32-bit dtypes pack along sublanes.
    return SUBLANE * max(1, 4 // jnp.dtype(dtype).itemsize)


def make_state_encoder_kernel(hidden_dim, hidden_pad):
    inv_n = 1.0 / float(hidden_dim)
    need_mask = hidden_pad != hidden_dim

    def kernel(x_ref, w_ref, p_ref, o_ref):
        # bf16 MXU operands, f32 accumulation.
        x = x_ref[...].astype(jnp.bfloat16)
        h = jnp.dot(x, w_ref[...], preferred_element_type=jnp.float32)

        p = p_ref[...]                 # (8, hidden_pad) f32 broadcast params
        bias = p[0:1, :]
        gamma = p[1:2, :]
        beta = p[2:3, :]

        h = h + bias

        # LayerNorm over the TRUE hidden_dim features.  Padded columns of W
        # and bias are exactly zero, so padded lanes of h are 0 and the lane
        # sum over hidden_pad equals the sum over hidden_dim.
        mean = jnp.sum(h, axis=-1, keepdims=True) * inv_n
        centered = h - mean
        if need_mask:
            # Row 3 of p is a 0/1 lane mask: one vmul zeroes the padded lanes
            # (which hold -mean) out of the variance -> exact unpadded stats.
            sq = centered * p[3:4, :]
        else:
            sq = centered
        var = jnp.sum(sq * sq, axis=-1, keepdims=True) * inv_n

        y = centered * jax.lax.rsqrt(var + LN_EPS) * gamma + beta

        # LeakyReLU (slope < 1  =>  max(y, slope*y) is exact).
        o_ref[...] = jnp.maximum(y, LEAKY_SLOPE * y).astype(o_ref.dtype)

    return kernel


def _default_tile_b(B, sub, obs_dim, hidden_pad, out_bytes):
    """Batch-tile heuristic (multiple of `sub` rows).

    - single tile for small batches,
    - ~8 grid steps for large batches (keeps both v7x TensorCores busy via
      dimension_semantics=("parallel",)),
    - 256..1024 rows per step for large batches (amortize ~0.35us/step, ~86%
      of HBM roofline on v5e/v6e at 512-1024 rows),
    - capped by a ~40 MiB VMEM budget (fits v7x's 64 MiB physical VMEM).
    """
    # Double-buffered x / out tiles + ~4 full-width f32 compiler temporaries.
    per_row = 2 * obs_dim * 4 + 2 * hidden_pad * out_bytes + 4 * hidden_pad * 4
    vmem_cap = max(sub, (40 * 1024 * 1024 // per_row) // sub * sub)

    if B <= 256:
        t = max(sub, (B // sub) * sub)           # one (or two) small tiles
    else:
        t = _round_up(pl.cdiv(B, 8), sub)        # aim for ~8 grid steps
        t = min(max(t, 256), 1024)
        t = min(t, (B // sub) * sub)             # tile never exceeds the batch
    return min(max(t, sub), vmem_cap)


def state_encoder_forward(x, params, *, tile_b=None, out_dtype=jnp.bfloat16,
                          return_padded=False, single_buffer_params=False):
    """StateEncoder forward: LeakyReLU(LayerNorm(x @ W + b)).

    x: [..., observation_shape] float32 (any leading batch dims).
    params: dict with
      'w' : [observation_shape, hidden_pad] bf16 (cols >= hidden_dim are 0)
      'p' : [8, hidden_pad] f32 (row0=bias, row1=gamma, row2=beta, row3=mask)
      'hidden_dim' : true hidden size
    Returns [..., hidden_dim] (or [..., hidden_pad] if return_padded) in
    out_dtype (default bf16: the LayerNorm+LeakyReLU result is unit-scale).
    """
    w = params["w"]
    p = params["p"]
    hidden_dim = params["hidden_dim"]
    obs_dim, hidden_pad = w.shape
    out_bytes = jnp.dtype(out_dtype).itemsize
    sub = _sublane(out_dtype)

    lead_shape = x.shape[:-1]
    x2 = x.reshape(-1, obs_dim)
    B = x2.shape[0]

    if tile_b is None:
        tile_b = _default_tile_b(B, sub, obs_dim, hidden_pad, out_bytes)
    else:
        tile_b = max(sub, _round_up(tile_b, sub))

    # Only degenerate tiny batches (B < tile_b) get padded; otherwise the
    # ragged last block is handled by Pallas (reads padded, writes masked).
    B_run = B
    if tile_b > B:
        x2 = jnp.pad(x2, ((0, tile_b - B), (0, 0)))
        B_run = tile_b

    grid = (pl.cdiv(B_run, tile_b),)

    if single_buffer_params:
        # Grid-invariant blocks: nothing to pipeline, halve their VMEM.
        w_spec = pl.BlockSpec((obs_dim, hidden_pad), lambda i: (0, 0),
                              pipeline_mode=pl.Buffered(1))
        p_spec = pl.BlockSpec((8, hidden_pad), lambda i: (0, 0),
                              pipeline_mode=pl.Buffered(1))
    else:
        w_spec = pl.BlockSpec((obs_dim, hidden_pad), lambda i: (0, 0))
        p_spec = pl.BlockSpec((8, hidden_pad), lambda i: (0, 0))

    kernel = make_state_encoder_kernel(hidden_dim, hidden_pad)

    out = pl.pallas_call(
        kernel,
        out_shape=jax.ShapeDtypeStruct((B_run, hidden_pad), out_dtype),
        grid_spec=pltpu.PrefetchScalarGridSpec(
            num_scalar_prefetch=0,
            grid=grid,
            in_specs=[
                pl.BlockSpec((tile_b, obs_dim), lambda i: (i, 0)),
                w_spec,
                p_spec,
            ],
            out_specs=pl.BlockSpec((tile_b, hidden_pad), lambda i: (i, 0)),
        ),
        compiler_params=pltpu.CompilerParams(
            dimension_semantics=("parallel",),
            vmem_limit_bytes=48 * 1024 * 1024,
        ),
    )(x2, w, p)

    if B_run != B:
        out = out[:B]
    if return_padded:
        return out.reshape(*lead_shape, hidden_pad)
    if hidden_pad != hidden_dim:
        out = out[:, :hidden_dim]
    return out.reshape(*lead_shape, hidden_dim)


def init_params(key, observation_shape, hidden_dim):
    """Deterministic synthetic init matching nn.Linear / nn.LayerNorm layout."""
    kw, kb = jax.random.split(key)
    hidden_pad = _round_up(hidden_dim, LANE)

    w = jax.random.normal(kw, (observation_shape, hidden_dim), jnp.float32) * 0.1
    b = jax.random.normal(kb, (hidden_dim,), jnp.float32) * 0.05
    gamma = jnp.ones((hidden_dim,), jnp.float32)   # LayerNorm weight init
    beta = jnp.zeros((hidden_dim,), jnp.float32)   # LayerNorm bias init

    w_pad = jnp.zeros((observation_shape, hidden_pad), jnp.float32)
    w_pad = w_pad.at[:, :hidden_dim].set(w)
    p = jnp.zeros((8, hidden_pad), jnp.float32)
    p = p.at[0, :hidden_dim].set(b)        # bias
    p = p.at[1, :hidden_dim].set(gamma)    # LayerNorm gamma
    p = p.at[2, :hidden_dim].set(beta)     # LayerNorm beta
    p = p.at[3, :hidden_dim].set(1.0)      # 0/1 lane mask for the variance

    # The kernel's LayerNorm mean relies on padded lanes of W / bias / gamma /
    # beta being exactly zero -- fail loudly if a reload ever breaks that.
    assert not bool(jnp.any(w_pad[:, hidden_dim:] != 0.0))
    assert not bool(jnp.any(p[:3, hidden_dim:] != 0.0))

    return dict(
        w=w_pad.astype(jnp.bfloat16),   # bf16 MXU operand, halves weight DMA
        p=p,
        hidden_dim=hidden_dim,
        # unpadded f32 copies for the pure-JAX reference
        w_f32=w, b_f32=b, gamma_f32=gamma, beta_f32=beta,
    )


def reference_forward(x, params):
    h = x @ params["w_f32"] + params["b_f32"]
    mean = jnp.mean(h, axis=-1, keepdims=True)
    var = jnp.mean((h - mean) ** 2, axis=-1, keepdims=True)
    h = (h - mean) * jax.lax.rsqrt(var + LN_EPS)
    h = h * params["gamma_f32"] + params["beta_f32"]
    return jnp.where(h > 0, h, LEAKY_SLOPE * h)


if __name__ == "__main__":
    # Small shapes consistent with the module: batch=8, observation_shape=32,
    # hidden_dim=32.
    B, OBS_DIM, HIDDEN_DIM = 8, 32, 32

    key = jax.random.PRNGKey(0)
    kx, kp = jax.random.split(key)
    x = jax.random.normal(kx, (B, OBS_DIM), jnp.float32)
    params = init_params(kp, OBS_DIM, HIDDEN_DIM)

    ref = reference_forward(x, params)

    # Default path: bf16 output (halved writeback).
    out = state_encoder_forward(x, params)
    out = jax.block_until_ready(out)
    assert out.shape == (B, HIDDEN_DIM)
    assert out.dtype == jnp.bfloat16
    # bf16 MXU operands + bf16 output rounding on unit-scale LayerNorm output:
    # well inside 3e-2.
    assert jnp.allclose(out.astype(jnp.float32), ref, rtol=3e-2, atol=3e-2), \
        "bf16-output mismatch vs reference"

    # f32-output path.
    out32 = state_encoder_forward(x, params, out_dtype=jnp.float32)
    out32 = jax.block_until_ready(out32)
    assert out32.shape == (B, HIDDEN_DIM) and out32.dtype == jnp.float32
    assert jnp.allclose(out32, ref, rtol=3e-2, atol=3e-2), \
        "f32-output mismatch vs reference"

    print("KERNEL_OK")
</pallas_src>

<mosaic_0001>
module attributes {stable_mosaic.version = 11 : i64} {
  func.func @kernel(%arg0: i32, %arg1: memref<16x32xf32, #tpu.memory_space<vmem>>, %arg2: memref<32x128xbf16, #tpu.memory_space<vmem>>, %arg3: memref<8x128xf32, #tpu.memory_space<vmem>>, %arg4: memref<16x128xbf16, #tpu.memory_space<vmem>>) attributes {dimension_semantics = [#tpu.dimension_semantics<parallel>], iteration_bounds = array<i64: 1>, scalar_prefetch = 0 : i64, scratch_operands = 0 : i64, tpu.core_type = #tpu.core_type<tc>, window_params = [{transform_indices = @transform_0, window_bounds = array<i64: 16, 32>}, {pipeline_mode = #tpu.pipeline_mode<synchronous>, transform_indices = @transform_1, window_bounds = array<i64: 32, 128>}, {pipeline_mode = #tpu.pipeline_mode<synchronous>, transform_indices = @transform_2, window_bounds = array<i64: 8, 128>}, {transform_indices = @transform_3, window_bounds = array<i64: 16, 128>}]} {
    %c0 = arith.constant 0 : index
    %c0_0 = arith.constant 0 : index
    %0 = vector.load %arg1[%c0, %c0_0] : memref<16x32xf32, #tpu.memory_space<vmem>>, vector<16x32xf32>
    %1 = arith.truncf %0 : vector<16x32xf32> to vector<16x32xbf16>
    %c0_1 = arith.constant 0 : index
    %c0_2 = arith.constant 0 : index
    %2 = vector.load %arg2[%c0_1, %c0_2] : memref<32x128xbf16, #tpu.memory_space<vmem>>, vector<32x128xbf16>
    %cst = arith.constant dense<0.000000e+00> : vector<16x128xf32>
    %3 = tpu.matmul %1, %2, %cst {dimension_numbers = #tpu.dot_dimension_numbers<[1], [0], [0], [1], [0, 0, 1, 1], [], []>} : vector<16x32xbf16>, vector<32x128xbf16>, vector<16x128xf32> -> vector<16x128xf32>
    %c0_3 = arith.constant 0 : index
    %c0_4 = arith.constant 0 : index
    %4 = vector.load %arg3[%c0_3, %c0_4] : memref<8x128xf32, #tpu.memory_space<vmem>>, vector<8x128xf32>
    %5 = vector.extract_strided_slice %4 {offsets = [0, 0], sizes = [1, 128], strides = [1, 1]} : vector<8x128xf32> to vector<1x128xf32>
    %6 = vector.extract_strided_slice %4 {offsets = [1, 0], sizes = [1, 128], strides = [1, 1]} : vector<8x128xf32> to vector<1x128xf32>
    %7 = vector.extract_strided_slice %4 {offsets = [2, 0], sizes = [1, 128], strides = [1, 1]} : vector<8x128xf32> to vector<1x128xf32>
    %8 = vector.broadcast %5 : vector<1x128xf32> to vector<16x128xf32>
    %9 = arith.addf %3, %8 : vector<16x128xf32>
    %cst_5 = arith.constant dense<0.000000e+00> : vector<16xf32>
    %10 = vector.multi_reduction <add>, %9, %cst_5 [1] : vector<16x128xf32> to vector<16xf32>
    %11 = vector.shape_cast %10 : vector<16xf32> to vector<16x1xf32>
    %cst_6 = arith.constant 3.125000e-02 : f32
    %12 = vector.broadcast %cst_6 : f32 to vector<16x1xf32>
    %13 = arith.mulf %11, %12 : vector<16x1xf32>
    %14 = vector.broadcast %13 : vector<16x1xf32> to vector<16x128xf32>
    %15 = arith.subf %9, %14 : vector<16x128xf32>
    %16 = vector.extract_strided_slice %4 {offsets = [3, 0], sizes = [1, 128], strides = [1, 1]} : vector<8x128xf32> to vector<1x128xf32>
    %17 = vector.broadcast %16 : vector<1x128xf32> to vector<16x128xf32>
    %18 = arith.mulf %15, %17 : vector<16x128xf32>
    %19 = arith.mulf %18, %18 : vector<16x128xf32>
    %cst_7 = arith.constant dense<0.000000e+00> : vector<16xf32>
    %20 = vector.multi_reduction <add>, %19, %cst_7 [1] : vector<16x128xf32> to vector<16xf32>
    %21 = vector.shape_cast %20 : vector<16xf32> to vector<16x1xf32>
    %cst_8 = arith.constant 3.125000e-02 : f32
    %22 = vector.broadcast %cst_8 : f32 to vector<16x1xf32>
    %23 = arith.mulf %21, %22 : vector<16x1xf32>
    %cst_9 = arith.constant 9.99999974E-6 : f32
    %24 = vector.broadcast %cst_9 : f32 to vector<16x1xf32>
    %25 = arith.addf %23, %24 : vector<16x1xf32>
    %26 = math.rsqrt %25 : vector<16x1xf32>
    %27 = vector.broadcast %26 : vector<16x1xf32> to vector<16x128xf32>
    %28 = arith.mulf %15, %27 : vector<16x128xf32>
    %29 = vector.broadcast %6 : vector<1x128xf32> to vector<16x128xf32>
    %30 = arith.mulf %28, %29 : vector<16x128xf32>
    %31 = vector.broadcast %7 : vector<1x128xf32> to vector<16x128xf32>
    %32 = arith.addf %30, %31 : vector<16x128xf32>
    %cst_10 = arith.constant 0.00999999977 : f32
    %33 = vector.broadcast %cst_10 : f32 to vector<16x128xf32>
    %34 = arith.mulf %33, %32 : vector<16x128xf32>
    %35 = arith.maximumf %32, %34 : vector<16x128xf32>
    %36 = arith.truncf %35 : vector<16x128xf32> to vector<16x128xbf16>
    %c0_11 = arith.constant 0 : index
    %c0_12 = arith.constant 0 : index
    %37 = vector.load %arg4[%c0_11, %c0_12] : memref<16x128xbf16, #tpu.memory_space<vmem>>, vector<16x128xbf16>
    tpu.vector_store %arg4[%c0_11, %c0_12], %36 {strides = array<i32>} : memref<16x128xbf16, #tpu.memory_space<vmem>>, vector<16x128xbf16>,
    return
  }
  func.func @transform_0(%arg0: i32) -> (i32, i32) {
    %c0_i32 = arith.constant 0 : i32
    %c0_i32_0 = arith.constant 0 : i32
    return %arg0, %c0_i32 : i32, i32
  }
  func.func @transform_1(%arg0: i32) -> (i32, i32) {
    %c0_i32 = arith.constant 0 : i32
    %c0_i32_0 = arith.constant 0 : i32
    %c0_i32_1 = arith.constant 0 : i32
    return %c0_i32, %c0_i32_0 : i32, i32
  }
  func.func @transform_2(%arg0: i32) -> (i32, i32) {
    %c0_i32 = arith.constant 0 : i32
    %c0_i32_0 = arith.constant 0 : i32
    %c0_i32_1 = arith.constant 0 : i32
    return %c0_i32, %c0_i32_0 : i32, i32
  }
  func.func @transform_3(%arg0: i32) -> (i32, i32) {
    %c0_i32 = arith.constant 0 : i32
    %c0_i32_0 = arith.constant 0 : i32
    return %arg0, %c0_i32 : i32, i32
  }
}

</mosaic_0001>

<bundles_post_ra>
// kernel: tpu_custom_call.1
= control target key start
LH: loop header
LB: loop body
LE: loop exit
PB: predicated region body
PF: predicated region fallthrough
CT: control target
= control target key end

     0   :  { %8 = vsyncpa [#allocation3], 0  ;;  %s413_s0 = inlined_call_operand.hbm [shape: f32[16,32], index: 0, kind: input, shape index: {}]   ;;  %s414_s1 = inlined_call_operand.hbm [shape: bf16[32,128], index: 1, kind: input, shape index: {}]   ;;  %s415_s2 = inlined_call_operand.hbm [shape: f32[8,128], index: 2, kind: input, shape index: {}]   ;;  %s416_s3 = inlined_call_operand.hbm [shape: bf16[16,128], index: 3, kind: output, shape index: {}]  }
   0x1   :  { %9 = vsyncpa [#allocation6], 0 }
   0x2   :  { %10 = vsyncpa [#allocation4], 0  ;;  %s329_s12 = smov [#allocation5]   ;;  %s235_s16 = scalar_lea.hbm %s414_s1, 256 }
   0x3   :  { %s28_s13 = sshll.u32 %s329_s12, 4  ;;  %p236_p0 = scmp.ne.s32.totalorder %s414_s1, %s235_s16  ;;  %s29_s13 = int_to_ptr.vmem [resolvable:$true] %s28_s13 }
   0x4   :  { %p239_p1 = scmp.lt.u32.totalorder %s235_s16, %s414_s1 }
   0x6   :  { %p241_p2 = pnand %p239_p1, %p236_p0 }
   0x8   :  { %244 = shalt.err (!%p241_p2)
}
   0x9   :  { %s245_s21 = scalar_lea.vmem %s29_s13, 256  ;;  %p250_p4 = scmp.lt.s32.totalorder %s29_s13, %s29_s13 }
   0xa   :  { %p246_p3 = scmp.ne.s32.totalorder %s29_s13, %s245_s21  ;;  %p251_p5 = scmp.lt.s32.totalorder %s245_s21, %s245_s21 }
   0xc   :  { %p252_p6 = por %p251_p5, %p250_p4 }
   0xe   :  { %p253_p7 = pnand %p252_p6, %p246_p3 }
  0x10   :  { %256 = shalt.err (!%p253_p7)
}
  0x11   :  { %s330_s22 = smov 64   ;;  %s331_s23 = smov 4  }
  0x12   :  { %34 = dma.hbm_to_vmem [thread:$0]  %s414_s1, 256, %s29_s13, [#allocation6], %s330_s22, %s330_s22, %s331_s23  }
  0x13   :  { %s332_s26 = smov [#allocation2]   ;;  %s257_s30 = scalar_lea.hbm %s413_s0, 256 }
  0x14   :  { %s16_s27 = sshll.u32 %s332_s26, 4  ;;  %p258_p8 = scmp.ne.s32.totalorder %s413_s0, %s257_s30  ;;  %s17_s27 = int_to_ptr.vmem [resolvable:$true] %s16_s27 }
  0x15   :  { %p261_p9 = scmp.lt.u32.totalorder %s257_s30, %s413_s0 }
  0x17   :  { %p263_p10 = pnand %p261_p9, %p258_p8 }
  0x19   :  { %266 = shalt.err (!%p263_p10)
}
  0x1a   :  { %s267_s8 = scalar_lea.vmem %s17_s27, 256  ;;  %p272_p12 = scmp.lt.s32.totalorder %s17_s27, %s17_s27 }
  0x1b   :  { %p268_p11 = scmp.ne.s32.totalorder %s17_s27, %s267_s8  ;;  %p273_p13 = scmp.lt.s32.totalorder %s267_s8, %s267_s8 }
  0x1d   :  { %p274_p0 = por %p273_p13, %p272_p12 }
  0x1f   :  { %p275_p1 = pnand %p274_p0, %p268_p11 }
  0x21   :  { %278 = shalt.err (!%p275_p1)
}
  0x22   :  { %s333_s1 = smov 128   ;;  %s334_s9 = smov 8  }
  0x23   :  { %22 = dma.hbm_to_vmem [thread:$0]  %s413_s0, 256, %s17_s27, [#allocation3], %s333_s1, %s333_s1, %s334_s9  }
  0x24   :  { %s335_s12 = smov [#allocation7]   ;;  %s279_s16 = scalar_lea.hbm %s415_s2, 128 }
  0x25   :  { %s41_s13 = sshll.u32 %s335_s12, 4  ;;  %p280_p2 = scmp.ne.s32.totalorder %s415_s2, %s279_s16  ;;  %s42_s13 = int_to_ptr.vmem [resolvable:$true] %s41_s13 }
  0x26   :  { %p283_p3 = scmp.lt.u32.totalorder %s279_s16, %s415_s2 }
  0x28   :  { %p285_p4 = pnand %p283_p3, %p280_p2 }
  0x2a   :  { %288 = shalt.err (!%p285_p4)
}
  0x2b   :  { %s289_s21 = scalar_lea.vmem %s42_s13, 128  ;;  %p294_p6 = scmp.lt.s32.totalorder %s42_s13, %s42_s13 }
  0x2c   :  { %p290_p5 = scmp.ne.s32.totalorder %s42_s13, %s289_s21  ;;  %p295_p7 = scmp.lt.s32.totalorder %s289_s21, %s289_s21 }
  0x2e   :  { %p296_p8 = por %p295_p7, %p294_p6 }
  0x30   :  { %p297_p9 = pnand %p296_p8, %p290_p5 }
  0x32   :  { %300 = shalt.err (!%p297_p9)
}
  0x33   :  { %44 = dma.hbm_to_vmem [thread:$0]  %s415_s2, 128, %s42_s13, [#allocation6]  }
  0x34   :  { %323 = dma.done.wait [#allocation3], 256  }
  0x35   :  { %324 = vsyncadd [#allocation3], 4294967040 }
  0x36   :  { %325 = dma.done.wait [#allocation6], 384  }
  0x37   :  { %326 = vsyncadd [#allocation6], 4294966912  ;;  %v336_v0 = vmov 0.0   ;;  %vm337_vm0 = vmmov 0   ;;  %v229_v1 = vld [vmem:[#allocation5] sm:$0xff]   ;;  %v230_v2 = vld [vmem:[#allocation5 + $0x8] sm:$0xff]   ;;  %v63_v6 = vlaneseq }
  0x38   :  { %211 = vmatprep.subr.bf16.mxu0 %v336_v0  ;;  %215 = vmatprep.mubr.msk.bf16.mxu0 %vm337_vm0, %v336_v0  ;;  %v55_v3 = vld [vmem:[#allocation2] sm:$0xff]  ;;  %v56_v4 = vld [vmem:[#allocation2 + $0x8] sm:$0xff]  ;;  %vm79_vm1 = vcmask 261120   ;;  %s338_s2 = smov [#allocation8]  }
  0x39   :  { %212 = vmatpush3.bf16.msra.mxu0 %v229_v1  ;;  %v57_v5 = vpack.c.bf16 %v56_v4, %v55_v3  ;;  %v64_v7 = vshrl.u32 %v63_v6, 7  ;;  %v62_v9 = vld [vmem:[#allocation7] sm:$0xff]  ;;  %s183_s25 = sshll.u32 %s338_s2, 4  ;;  %s184_s25 = int_to_ptr.vmem [resolvable:$true] %s183_s25 }
  0x3a   :  { %213 = vmatprep.subr.bf16.mxu0 %v336_v0  ;;  %s301_s26 = scalar_lea.vmem %s184_s25, 128  ;;  %p306_p11 = scmp.lt.s32.totalorder %s184_s25, %s184_s25 }
  0x3b   :  { %v65_v8 = vsub.s32 0, %v64_v7  ;;  %v134_v17 = vsub.s32 3, %v64_v7  ;;  %v154_v35 = vsub.s32 1, %v64_v7  ;;  %v160_v36 = vsub.s32 2, %v64_v7  ;;  %p302_p10 = scmp.ne.s32.totalorder %s184_s25, %s301_s26  ;;  %p307_p12 = scmp.lt.s32.totalorder %s301_s26, %s301_s26 }
  0x3d   :  { %214 = vmatpush3.bf16.msra.mxu0 %v230_v2  ;;  %v66_v10 = vrot.slane %v62_v9, %v65_v8  ;;  %v135_v20 = vrot.slane %v62_v9, %v134_v17  ;;  %v155_v37 = vrot.slane %v62_v9, %v154_v35  ;;  %v161_v40 = vrot.slane %v62_v9, %v160_v36  ;;  %p308_p13 = por %p307_p12, %p306_p11 }
  0x3f   :  { %p309_p0 = pnand %p308_p13, %p302_p10 }
  0x40   :  { %216 = vmatmul.mubr.msk.bf16.vlgmr.msra.gmra.mrb[0].mxu0 %vm79_vm1, %v57_v5 }
 0x113   :  { %v117_v11 = vpop.f32.mrb[0].mxu0 }
 0x114   :  { %v118_v12 = vadd.f32 %v117_v11, %v66_v10  ;;  %v217_v13 = vpop.f32.mrb[1].mxu0 }
 0x115   :  { %v120_v14 = vpop.f32.mrb[2].mxu0 }
 0x116   :  { %124 = vadd.xlane.f32.xlu0 %v118_v12  ;;  %v218_v15 = vpop.f32.mrb[3].mxu0  ;;  %v121_v16 = vadd.f32 %v120_v14, %v66_v10 }
 0x11a   :  { %126 = vadd.xlane.f32.xlu0 %v121_v16 }
 0x1a3   :  { %v125_v18 = vpop.xlane.xlu0 %124 }
 0x1a4   :  { %v128_v19 = vmul.f32 0.03125, %v125_v18 }
 0x1a6   :  { %v130_v21 = vsub.f32 %v118_v12, %v128_v19 }
 0x1a7   :  { %v127_v22 = vpop.xlane.xlu0 %126 }
 0x1a8   :  { %v129_v23 = vmul.f32 0.03125, %v127_v22  ;;  %v136_v24 = vmul.f32 %v135_v20, %v130_v21 }
 0x1aa   :  { %v131_v25 = vsub.f32 %v121_v16, %v129_v23  ;;  %v138_v26 = vmul.f32 %v136_v24, %v136_v24 }
 0x1ac   :  { %140 = vadd.xlane.f32.xlu1 %v138_v26  ;;  %v137_v27 = vmul.f32 %v135_v20, %v131_v25 }
 0x1ae   :  { %v139_v28 = vmul.f32 %v137_v27, %v137_v27 }
 0x1b0   :  { %142 = vadd.xlane.f32.xlu1 %v139_v28 }
 0x239   :  { %v141_v29 = vpop.xlane.xlu1 %140 }
 0x23a   :  { %v144_v30 = vmul.f32 0.03125, %v141_v29 }
 0x23c   :  { %v146_v31 = vadd.f32 1e-05, %v144_v30 }
 0x23d   :  { %v143_v32 = vpop.xlane.xlu1 %142 }
 0x23e   :  { %231 = vrsqrt.f32 %v146_v31  ;;  %v145_v33 = vmul.f32 0.03125, %v143_v32 }
 0x240   :  { %v147_v34 = vadd.f32 1e-05, %v145_v33 }
 0x242   :  { %233 = vrsqrt.f32 %v147_v34 }
 0x248   :  { %v232_v38 = vpop.eup %231 }
 0x249   :  { %v150_v39 = vmul.f32 %v232_v38, %v130_v21 }
 0x24b   :  { %v156_v41 = vmul.f32 %v155_v37, %v150_v39 }
 0x24c   :  { %v234_v42 = vpop.eup %233 }
 0x24d   :  { %v151_v43 = vmul.f32 %v234_v42, %v131_v25  ;;  %v162_v44 = vadd.f32 %v161_v40, %v156_v41 }
 0x24f   :  { %v157_v45 = vmul.f32 %v155_v37, %v151_v43  ;;  %v164_v47 = vmul.f32 0.01, %v162_v44 }
 0x251   :  { %v163_v46 = vadd.f32 %v161_v40, %v157_v45  ;;  %v166_v49 = vmax.f32 %v162_v44, %v164_v47 }
 0x253   :  { %v165_v48 = vmul.f32 0.01, %v163_v46 }
 0x255   :  { %v167_v50 = vmax.f32 %v163_v46, %v165_v48 }
 0x257   :  { %v206_v51 = vpack.c.bf16 %v167_v50, %v166_v49 }
 0x259   :  { %207 = vst [vmem:[#allocation8] sm:$0xff] %v206_v51  }
 0x25a   :  { %312 = shalt.err (!%p309_p0)
}
 0x25b   :  { %s313_s29 = scalar_lea.hbm %s416_s3, 128 }
 0x25c   :  { %p314_p1 = scmp.ne.s32.totalorder %s416_s3, %s313_s29  ;;  %p317_p2 = scmp.lt.u32.totalorder %s313_s29, %s416_s3 }
 0x25e   :  { %p319_p3 = pnand %p317_p2, %p314_p1 }
 0x260   :  { %322 = shalt.err (!%p319_p3)
}
 0x261   :  { %189 = dma.vmem_to_hbm [thread:$0]  %s184_s25, 128, %s416_s3, [#allocation4], %s330_s22, %s330_s22, %s331_s23  }
 0x262   :  { %327 = dma.done.wait [#allocation4], 128  }
 0x263   :  { %328 = vsyncadd [#allocation4], 4294967168 }
 0x264   :  { %193 = vsyncpa [#allocation3], 1 }
 0x265   :  { %194 = vsyncpa [#allocation6], 1 }
 0x266   :  { %195 = vsyncpa [#allocation4], 1 }

</bundles_post_ra>
